<compile_context>
chip_gen: v6e
topology: v6e:2x2x1
jax: 0.10.0
libtpu: 0.0.40
codegen_flags: <defaults>
</compile_context>

<pallas_src>
import functools
import math

import jax
import jax.numpy as jnp
from jax import lax
from jax.experimental import pallas as pl
from jax.experimental.pallas import tpu as pltpu


def _round_up(x, m):
    return ((x + m - 1) // m) * m


# ----------------------------------------------------------------------------
# Path 1 (general): table stays in HBM, per-row DMA gather, double-buffered
# across grid steps.
# ----------------------------------------------------------------------------
def _embedding_gather_kernel(ids_ref,    # SMEM (N_tot,) int32  (scalar prefetch)
                             lut_hbm,    # ANY  (V, D) table, stays in HBM
                             o_ref,      # VMEM (TQ, D) output tile
                             rows,       # VMEM (2, TQ, D) double-buffered gather scratch
                             sems,       # DMA sems (2,) - one shared sem per slot
                             *, tq, vmax, scale):
    i = pl.program_id(0)
    nsteps = pl.num_programs(0)
    slot = i % 2
    unroll = min(8, tq)

    def row_copy(block_idx, slot_idx, t):
        # Same descriptor is rebuilt for start and wait (identical src/dst/sem).
        # Clamp ids so an out-of-range token can never issue an OOB HBM DMA.
        tok = jnp.clip(ids_ref[block_idx * tq + t], 0, vmax)
        return pltpu.make_async_copy(
            lut_hbm.at[pl.ds(tok, 1)],          # (1, D) row in HBM
            rows.at[slot_idx, pl.ds(t, 1)],     # (1, D) slot in VMEM scratch
            sems.at[slot_idx])                  # shared per-slot DMA semaphore

    def start_block(block_idx, slot_idx):
        def body(t, carry):
            row_copy(block_idx, slot_idx, t).start()
            return carry
        lax.fori_loop(0, tq, body, 0, unroll=unroll)

    def wait_block(block_idx, slot_idx):
        # Waiting once per started copy on the shared semaphore; the last wait
        # can only complete once every row of the block has landed.
        def body(t, carry):
            row_copy(block_idx, slot_idx, t).wait()
            return carry
        lax.fori_loop(0, tq, body, 0, unroll=unroll)

    # Prime the pipeline on the very first step.
    @pl.when(i == 0)
    def _():
        start_block(0, 0)

    # Prefetch the *next* block's rows into the other slot so the HBM row
    # fetches overlap this step's scale + store and the pipelined writeback.
    @pl.when(i + 1 < nsteps)
    def _():
        start_block(i + 1, 1 - slot)

    # Wait for this block's rows (launched one step ago), then fused
    # sqrt(emb_size) scale + lane-dense (TQ, D) store.
    wait_block(i, slot)
    o_ref[...] = (rows[slot] * scale).astype(o_ref.dtype)


def _gather_forward(ids_flat, lut, tq):
    V, D = lut.shape
    n = ids_flat.shape[0]
    n_tot = _round_up(max(n, 1), tq)
    if n_tot != n:
        ids_flat = jnp.pad(ids_flat, (0, n_tot - n))   # pad with id 0 (valid row)
    itemsize = jnp.dtype(lut.dtype).itemsize

    # ~ (2-slot gather scratch + double-buffered output) + slack; default tq
    # selection keeps this <= 32 MiB so it fits v7x's scoped VMEM as well.
    vmem_bytes = int(min(max(5 * tq * D * itemsize + (1 << 20), 32 << 20), 64 << 20))

    kernel = functools.partial(_embedding_gather_kernel,
                               tq=tq, vmax=V - 1, scale=float(math.sqrt(D)))

    out = pl.pallas_call(
        kernel,
        out_shape=jax.ShapeDtypeStruct((n_tot, D), lut.dtype),
        grid_spec=pltpu.PrefetchScalarGridSpec(
            num_scalar_prefetch=1,                       # ids -> SMEM
            grid=(n_tot // tq,),
            in_specs=[pl.BlockSpec(memory_space=pl.ANY)],  # table stays in HBM
            out_specs=pl.BlockSpec((tq, D), lambda i, ids: (i, 0)),
            scratch_shapes=[pltpu.VMEM((2, tq, D), lut.dtype),
                            pltpu.SemaphoreType.DMA((2,))]),
        compiler_params=pltpu.CompilerParams(
            # The cross-step gather prefetch carries state (scratch slot and
            # semaphores) from step i to i+1, so this axis must run
            # sequentially.  A v7x dual-TC split would need per-core priming
            # via pl.core_map; not done here.
            dimension_semantics=("arbitrary",),
            vmem_limit_bytes=vmem_bytes),
    )(ids_flat, lut)
    return out[:n]


# ----------------------------------------------------------------------------
# Path 2 (fast path, small tables): whole (V, D) table resident in VMEM,
# gather done as a one-hot MXU matmul - no per-row HBM DMAs.
# ----------------------------------------------------------------------------
def _small_table_kernel(ids_ref,   # VMEM (1, TQ, 1) int32
                        lut_ref,   # VMEM (V, D) - resident (constant index_map)
                        o_ref,     # VMEM (TQ, D)
                        *, scale):
    idx = ids_ref[0]                                     # (TQ, 1) int32
    tq = idx.shape[0]
    V = lut_ref.shape[0]
    # Out-of-range ids give an all-zero one-hot row -> zero output (safe).
    onehot = (idx == lax.broadcasted_iota(jnp.int32, (tq, V), 1)).astype(lut_ref.dtype)
    out = jnp.dot(onehot, lut_ref[...], preferred_element_type=jnp.float32)
    o_ref[...] = (out * scale).astype(o_ref.dtype)


def _small_table_forward(ids_flat, lut, tq):
    V, D = lut.shape
    n = ids_flat.shape[0]
    n_tot = _round_up(max(n, 1), tq)
    if n_tot != n:
        ids_flat = jnp.pad(ids_flat, (0, n_tot - n))
    nb = n_tot // tq
    ids_3d = ids_flat.reshape(nb, tq, 1)

    kernel = functools.partial(_small_table_kernel, scale=float(math.sqrt(D)))
    out = pl.pallas_call(
        kernel,
        out_shape=jax.ShapeDtypeStruct((n_tot, D), lut.dtype),
        grid=(nb,),
        in_specs=[pl.BlockSpec((1, tq, 1), lambda i: (i, 0, 0)),
                  pl.BlockSpec((V, D), lambda i: (0, 0))],   # same block every step -> resident
        out_specs=pl.BlockSpec((tq, D), lambda i: (i, 0)),
        compiler_params=pltpu.CompilerParams(
            dimension_semantics=("parallel",)),              # steps are independent
    )(ids_3d, lut)
    return out[:n]


# ----------------------------------------------------------------------------
# Public wrapper:  out[..., :] = lut[ids[...], :] * sqrt(emb_size)
# ----------------------------------------------------------------------------
def embeddings_forward(ids, lut, *, block_tokens=None, force_gather=False):
    orig_shape = ids.shape
    V, D = lut.shape
    ids_flat = jnp.asarray(ids).reshape(-1).astype(jnp.int32)
    n = ids_flat.shape[0]
    itemsize = jnp.dtype(lut.dtype).itemsize

    small_table = (V * D * itemsize <= (2 << 20)) and (V <= 1024)
    if small_table and not force_gather:
        tq = block_tokens if block_tokens is not None else min(512, _round_up(max(n, 1), 8))
        tq = max(8, _round_up(int(tq), 8))
        out = _small_table_forward(ids_flat, lut, tq)
    else:
        if block_tokens is None:
            # VMEM footprint ~ 4*TQ*D*itemsize (2-slot gather scratch +
            # double-buffered output); budget ~16 MiB so it fits v7x too.
            budget = 16 << 20
            tq = budget // (4 * D * itemsize)
            tq = min(512, max(8, tq))
            tq = min(tq, _round_up(max(n, 1), 8))
        else:
            tq = int(block_tokens)
        tq = max(8, (tq // 8) * 8)
        out = _gather_forward(ids_flat, lut, tq)

    # TODO(synk): optional dedup of repeated ids within a block (saves HBM
    # bandwidth for heavily repeated tokens) is not implemented.
    return out.reshape(*orig_shape, D)


# ----------------------------------------------------------------------------
# Demo / correctness check
# ----------------------------------------------------------------------------
if __name__ == "__main__":
    B, S, V, D = 2, 8, 64, 128          # small shapes; D lane-aligned (x128)
    key = jax.random.PRNGKey(0)
    k_ids, k_lut = jax.random.split(key)

    ids = jax.random.randint(k_ids, (B, S), 0, V, dtype=jnp.int32)
    lut = jax.random.normal(k_lut, (V, D), jnp.float32)

    # Pure-JAX reference of Embeddings.forward
    ref = lut[ids] * math.sqrt(D)

    # 1) Small-table fast path (VMEM-resident table, one-hot MXU gather).
    out_small = jax.block_until_ready(embeddings_forward(ids, lut))
    assert out_small.shape == (B, S, D)
    assert jnp.allclose(out_small, ref, atol=1e-5, rtol=1e-5), "small-table path mismatch"

    # 2) General path (HBM table, double-buffered per-row DMA gather).
    out_gather = jax.block_until_ready(embeddings_forward(ids, lut, force_gather=True))
    assert out_gather.shape == (B, S, D)
    assert jnp.allclose(out_gather, ref, atol=1e-6, rtol=1e-6), "gather path mismatch"

    # TODO(synk): the module's CosineEmbeddingLoss criterion is unused in
    # forward() and intentionally not implemented.
    print("KERNEL_OK")
</pallas_src>

<mosaic_0001>
module attributes {stable_mosaic.version = 11 : i64} {
  func.func @_small_table_kernel(%arg0: i32, %arg1: memref<1x16x1xi32, #tpu.memory_space<vmem>>, %arg2: memref<64x128xf32, #tpu.memory_space<vmem>>, %arg3: memref<16x128xf32, #tpu.memory_space<vmem>>) attributes {dimension_semantics = [#tpu.dimension_semantics<parallel>], iteration_bounds = array<i64: 1>, scalar_prefetch = 0 : i64, scratch_operands = 0 : i64, tpu.core_type = #tpu.core_type<tc>, window_params = [{transform_indices = @transform_0, window_bounds = array<i64: 1, 16, 1>}, {pipeline_mode = #tpu.pipeline_mode<synchronous>, transform_indices = @transform_1, window_bounds = array<i64: 64, 128>}, {transform_indices = @transform_2, window_bounds = array<i64: 16, 128>}]} {
    %c0 = arith.constant 0 : index
    %c0_0 = arith.constant 0 : index
    %c0_1 = arith.constant 0 : index
    %0 = vector.load %arg1[%c0, %c0_0, %c0_1] : memref<1x16x1xi32, #tpu.memory_space<vmem>>, vector<1x16x1xi32>
    %1 = vector.shape_cast %0 : vector<1x16x1xi32> to vector<16x1xi32>
    %2 = tpu.iota {dimensions = array<i32: 1>} : vector<16x64xi32>
    %3 = vector.broadcast %1 : vector<16x1xi32> to vector<16x64xi32>
    %4 = arith.cmpi eq, %3, %2 : vector<16x64xi32>
    %5 = arith.extui %4 : vector<16x64xi1> to vector<16x64xi32>
    %6 = arith.sitofp %5 : vector<16x64xi32> to vector<16x64xf32>
    %c0_2 = arith.constant 0 : index
    %c0_3 = arith.constant 0 : index
    %7 = vector.load %arg2[%c0_2, %c0_3] : memref<64x128xf32, #tpu.memory_space<vmem>>, vector<64x128xf32>
    %cst = arith.constant dense<0.000000e+00> : vector<16x128xf32>
    %8 = tpu.matmul %6, %7, %cst {dimension_numbers = #tpu.dot_dimension_numbers<[1], [0], [0], [1], [0, 0, 1, 1], [], []>} : vector<16x64xf32>, vector<64x128xf32>, vector<16x128xf32> -> vector<16x128xf32>
    %cst_4 = arith.constant 11.3137083 : f32
    %9 = vector.broadcast %cst_4 : f32 to vector<16x128xf32>
    %10 = arith.mulf %8, %9 : vector<16x128xf32>
    %c0_5 = arith.constant 0 : index
    %c0_6 = arith.constant 0 : index
    %11 = vector.load %arg3[%c0_5, %c0_6] : memref<16x128xf32, #tpu.memory_space<vmem>>, vector<16x128xf32>
    tpu.vector_store %arg3[%c0_5, %c0_6], %10 {strides = array<i32>} : memref<16x128xf32, #tpu.memory_space<vmem>>, vector<16x128xf32>,
    return
  }
  func.func @transform_0(%arg0: i32) -> (i32, i32, i32) {
    %c0_i32 = arith.constant 0 : i32
    %c0_i32_0 = arith.constant 0 : i32
    %c0_i32_1 = arith.constant 0 : i32
    return %arg0, %c0_i32, %c0_i32_0 : i32, i32, i32
  }
  func.func @transform_1(%arg0: i32) -> (i32, i32) {
    %c0_i32 = arith.constant 0 : i32
    %c0_i32_0 = arith.constant 0 : i32
    %c0_i32_1 = arith.constant 0 : i32
    return %c0_i32, %c0_i32_0 : i32, i32
  }
  func.func @transform_2(%arg0: i32) -> (i32, i32) {
    %c0_i32 = arith.constant 0 : i32
    %c0_i32_0 = arith.constant 0 : i32
    return %arg0, %c0_i32 : i32, i32
  }
}

</mosaic_0001>

<bundles_post_ra>
// kernel: tpu_custom_call.1
= control target key start
LH: loop header
LB: loop body
LE: loop exit
PB: predicated region body
PF: predicated region fallthrough
CT: control target
= control target key end

     0   :  { %7 = vsyncpa [#allocation3], 0  ;;  %s276_s0 = inlined_call_operand.vmem [shape: s32[1,16,1], index: 0, kind: input, shape index: {}]   ;;  %s277_s1 = inlined_call_operand.hbm [shape: f32[64,128], index: 1, kind: input, shape index: {}]   ;;  %s278_s2 = inlined_call_operand.hbm [shape: f32[16,128], index: 2, kind: output, shape index: {}]  }
   0x1   :  { %8 = vsyncpa [#allocation4], 0  ;;  %s237_s9 = smov [#allocation2]  }
   0x2   :  { %s16_s10 = sshll.u32 %s237_s9, 4  ;;  %s17_s10 = int_to_ptr.vmem [resolvable:$true] %s16_s10 }
   0x3   :  { %s201_s11 = scalar_lea.vmem %s17_s10, 1024  ;;  %p206_p1 = scmp.lt.s32.totalorder %s17_s10, %s17_s10 }
   0x4   :  { %p202_p0 = scmp.ne.s32.totalorder %s17_s10, %s201_s11  ;;  %p207_p2 = scmp.lt.s32.totalorder %s201_s11, %s201_s11 }
   0x6   :  { %p208_p3 = por %p207_p2, %p206_p1 }
   0x8   :  { %p209_p4 = pnand %p208_p3, %p202_p0 }
   0xa   :  { %212 = shalt.err (!%p209_p4)
}
   0xb   :  { %s238_s12 = smov 128   ;;  %s239_s13 = smov 8  }
   0xc   :  { %22 = dma.hbm_to_vmem [thread:$0]  %s277_s1, 1024, %s17_s10, [#allocation3], %s238_s12, %s238_s12, %s239_s13  }
   0xd   :  { %233 = dma.done.wait [#allocation3], 1024  }
   0xe   :  { %234 = vsyncadd [#allocation3], 4294966272  ;;  %v240_v0 = vmov 0   ;;  %v26_v1 = vld [vmem:[%s276_s0] sm:$0xff]  ;;  %v49_v2 = vld [vmem:[#allocation2 + $0x38] sm:$0xff]  ;;  %v28_v11 = vlaneseq  ;;  %vm50_vm0 = vcmask 523264  }
   0xf   :  { %192 = vset.pattern.permute.xlu0 %v240_v0  ;;  %167 = vmatprep.subr.mxu0 %v49_v2  ;;  %v48_v3 = vld [vmem:[#allocation2 + $0x30] sm:$0xff]  ;;  %v27_v4 = vld [vmem:[%s276_s0 + $0x8] sm:$0xff]  ;;  %v46_v6 = vld [vmem:[#allocation2 + $0x20] sm:$0xff]  ;;  %v241_v14 = vmov 0.0   ;;  %s242_s0 = smov [#allocation5]  }
  0x10   :  { %31 = vperm.xlu0 %192, %v26_v1   ;;  %168 = vmatpush3.msra.mxu0 %v49_v2  ;;  %v47_v5 = vld [vmem:[#allocation2 + $0x28] sm:$0xff]  ;;  %v45_v7 = vld [vmem:[#allocation2 + $0x18] sm:$0xff]  ;;  %v44_v8 = vld [vmem:[#allocation2 + $0x10] sm:$0xff]  ;;  %v29_v12 = vand.u32 127, %v28_v11  ;;  %s141_s1 = sshll.u32 %s242_s0, 4  ;;  %s142_s1 = int_to_ptr.vmem [resolvable:$true] %s141_s1 }
  0x11   :  { %169 = vmatprep.subr.mxu0 %v48_v3  ;;  %v43_v9 = vld [vmem:[#allocation2 + $0x8] sm:$0xff]  ;;  %v42_v10 = vld [vmem:[#allocation2] sm:$0xff]  ;;  %s213_s20 = scalar_lea.vmem %s142_s1, 256  ;;  %p218_p6 = scmp.lt.s32.totalorder %s142_s1, %s142_s1 }
  0x12   :  { %170 = vmatpush3.msra.mxu0 %v48_v3  ;;  %p214_p5 = scmp.ne.s32.totalorder %s142_s1, %s213_s20  ;;  %p219_p7 = scmp.lt.s32.totalorder %s213_s20, %s213_s20 }
  0x13   :  { %171 = vmatprep.subr.mxu0 %v47_v5 }
  0x14   :  { %34 = vperm.xlu0 %192, %v27_v4   ;;  %172 = vmatpush3.msra.mxu0 %v47_v5  ;;  %p220_p8 = por %p219_p7, %p218_p6 }
  0x15   :  { %173 = vmatprep.subr.mxu0 %v46_v6 }
  0x16   :  { %174 = vmatpush3.msra.mxu0 %v46_v6  ;;  %p221_p9 = pnand %p220_p8, %p214_p5 }
  0x17   :  { %175 = vmatprep.subr.mxu0 %v45_v7 }
  0x18   :  { %176 = vmatpush3.msra.mxu0 %v45_v7 }
  0x19   :  { %177 = vmatprep.subr.mxu0 %v44_v8 }
  0x1a   :  { %178 = vmatpush3.msra.mxu0 %v44_v8 }
  0x1b   :  { %179 = vmatprep.subr.mxu0 %v43_v9 }
  0x1c   :  { %180 = vmatpush3.msra.mxu0 %v43_v9 }
  0x1d   :  { %181 = vmatprep.subr.mxu0 %v42_v10 }
  0x1e   :  { %182 = vmatpush3.msra.mxu0 %v42_v10 }
  0x8b   :  { %v32_v13 = vpop.permute.xlu0 %31 }
  0x8c   :  { %vm36_vm1 = vcmp.eq.s32.totalorder %v32_v13, %v29_v12 }
  0x8d   :  { %v153_v15 = vsel %vm36_vm1, 1.0, %v241_v14 }
  0x8e   :  { %183 = vmatprep.mubr.msk.f32.mxu0 %vm50_vm0, %v153_v15 }
  0x8f   :  { %v35_v16 = vpop.permute.xlu0 %34 }
  0x90   :  { %vm37_vm2 = vcmp.eq.s32.totalorder %v35_v16, %v29_v12 }
  0x91   :  { %v154_v17 = vsel %vm37_vm2, 1.0, %v241_v14 }
  0x92   :  { %184 = vmatmul.mubr.msk.f32.vlgmr.msra.gmra.mxu0 %vm50_vm0, %v154_v17 }
 0x152   :  { %v185_v18 = vpop.f32.mrf.mxu0 }
 0x153   :  { %v133_v19 = vmul.f32 11.313708, %v185_v18 }
 0x154   :  { %v123_v20 = vpop.f32.mrf.mxu0 }
 0x155   :  { %135 = vst [vmem:[#allocation5 + $0x8] sm:$0xff] %v133_v19  ;;  %v132_v21 = vmul.f32 11.313708, %v123_v20 }
 0x157   :  { %134 = vst [vmem:[#allocation5] sm:$0xff] %v132_v21 }
 0x158   :  { %224 = shalt.err (!%p221_p9)
}
 0x159   :  { %147 = dma.vmem_to_hbm [thread:$0]  %s142_s1, 256, %s278_s2, [#allocation4], %s238_s12, %s238_s12, %s239_s13  }
 0x15a   :  { %235 = dma.done.wait [#allocation4], 256  }
 0x15b   :  { %236 = vsyncadd [#allocation4], 4294967040 }
 0x15c   :  { %151 = vsyncpa [#allocation3], 1 }
 0x15d   :  { %152 = vsyncpa [#allocation4], 1 }

</bundles_post_ra>
